<compile_context>
chip_gen: v7x
topology: tpu7x:2x2x1
jax: 0.10.0
libtpu: 0.0.40
codegen_flags: <defaults>
</compile_context>

<pallas_src>
import functools
import math

import jax
import jax.numpy as jnp
from jax import lax
from jax.experimental import pallas as pl
from jax.experimental.pallas import tpu as pltpu


def _round_up(x, m):
    return (x + m - 1) // m * m


def _linear_kernel(x_ref, w_ref, b_ref, o_ref, acc_ref):
    # x_ref: (tm, tk)   w_ref: (tn, tk)  (torch layout; contract over K)
    # b_ref: (1, tn)    o_ref: (tm, tn)  acc_ref: (tm, tn) f32 scratch
    k = pl.program_id(2)

    @pl.when(k == 0)
    def _():
        acc_ref[...] = jnp.zeros_like(acc_ref)

    # y_tile += x_tile @ w_tile.T on the MXU, f32 accumulation.
    acc_ref[...] += lax.dot_general(
        x_ref[...],
        w_ref[...],
        dimension_numbers=(((1,), (1,)), ((), ())),
        preferred_element_type=jnp.float32,
    )

    @pl.when(k == pl.num_programs(2) - 1)
    def _():
        o_ref[...] = (acc_ref[...] + b_ref[...].astype(jnp.float32)).astype(o_ref.dtype)


@functools.partial(jax.jit, static_argnames=("in_shape", "out_shape", "compute_dtype"))
def linear_model_forward(x, weight, bias, *, in_shape, out_shape, compute_dtype=None):
    """Reproduces: Flatten(-len(in_shape)) -> Linear -> Unflatten(-1, out_shape).

    weight: (out_features, in_features)  -- torch nn.Linear layout, used as-is.
    bias:   (out_features,)
    compute_dtype: optionally jnp.bfloat16 on v6e/v7x for higher MXU throughput.
    """
    in_features = math.prod(in_shape)
    out_features = math.prod(out_shape)

    batch_dims = x.shape[: x.ndim - len(in_shape)]
    x_flat = x.reshape((-1, in_features))          # (B, K), row-major like torch
    B, K = x_flat.shape
    N = out_features
    out_dtype = x.dtype

    if compute_dtype is not None:
        x_flat = x_flat.astype(compute_dtype)
        weight = weight.astype(compute_dtype)

    # ---- tile selection ----------------------------------------------------
    # K: lane dim of both operands; pad to 128, tile at <=512 per reduction step.
    K_pad = _round_up(K, 128)
    tk = min(K_pad, 512)
    K_pad = _round_up(K_pad, tk)

    # N: output lane dim; keep tiles lane-dense (>=256) and, when N is big
    # enough, >=2 tiles so the "parallel" N axis can shard across v7x's 2 TCs.
    N_pad = _round_up(N, 128)
    if N_pad >= 512:
        tn = min(512, _round_up(N_pad // 2, 128))
    else:
        tn = N_pad
    N_pad = _round_up(N_pad, tn)

    # M (batch): pad to the 8-sublane granule; tile at 128 rows for large B.
    B_pad = _round_up(max(B, 1), 8)
    tm = min(B_pad, 128)
    B_pad = _round_up(B_pad, tm)

    # ---- zero-pad operands to tile multiples (sliced off afterwards) --------
    if (B_pad, K_pad) != (B, K):
        x_flat = jnp.pad(x_flat, ((0, B_pad - B), (0, K_pad - K)))
    w = weight                                      # (N, K): no HBM transpose
    if (N_pad, K_pad) != (N, K):
        w = jnp.pad(w, ((0, N_pad - N), (0, K_pad - K)))
    b2d = bias.astype(jnp.float32).reshape(1, N)
    if N_pad != N:
        b2d = jnp.pad(b2d, ((0, 0), (0, N_pad - N)))

    grid = (B_pad // tm, N_pad // tn, K_pad // tk)  # reduction axis (K) last

    # Advisory cost estimate for XLA scheduling around the custom call.
    cost = pl.CostEstimate(
        flops=2 * B_pad * K_pad * N_pad,
        transcendentals=0,
        bytes_accessed=(
            x_flat.size * x_flat.dtype.itemsize
            + w.size * w.dtype.itemsize
            + b2d.size * b2d.dtype.itemsize
            + B_pad * N_pad * jnp.dtype(out_dtype).itemsize
        ),
    )

    # Double-buffered input tiles + output tile + f32 accumulator, with headroom.
    in_item = x_flat.dtype.itemsize
    vmem_est = (
        2 * (tm * tk + tn * tk) * in_item            # pipelined x / w buffers
        + 2 * tn * 4                                 # bias tiles
        + 2 * tm * tn * jnp.dtype(out_dtype).itemsize  # output buffers
        + tm * tn * 4                                # accumulator scratch
    )
    vmem_limit = int(min(max(vmem_est + (4 << 20), 32 << 20), 96 << 20))

    y = pl.pallas_call(
        _linear_kernel,
        out_shape=jax.ShapeDtypeStruct((B_pad, N_pad), out_dtype),
        grid_spec=pltpu.PrefetchScalarGridSpec(
            num_scalar_prefetch=0,
            grid=grid,
            in_specs=[
                pl.BlockSpec((tm, tk), lambda i, j, k: (i, k)),   # activations
                pl.BlockSpec((tn, tk), lambda i, j, k: (j, k)),   # weight (N, K)
                pl.BlockSpec((1, tn), lambda i, j, k: (0, j)),    # bias
            ],
            out_specs=pl.BlockSpec((tm, tn), lambda i, j, k: (i, j)),
            scratch_shapes=[pltpu.VMEM((tm, tn), jnp.float32)],
        ),
        compiler_params=pltpu.CompilerParams(
            dimension_semantics=("parallel", "parallel", "arbitrary"),
            vmem_limit_bytes=vmem_limit,
        ),
        cost_estimate=cost,
    )(x_flat, w, b2d)

    y = y[:B, :N]                                    # drop padding
    return y.reshape(batch_dims + tuple(out_shape))


def init_linear_params(key, in_features, out_features, dtype=jnp.float32):
    # Deterministic init mirroring nn.Linear defaults: U(-1/sqrt(K), 1/sqrt(K)).
    kw, kb = jax.random.split(key)
    bound = 1.0 / math.sqrt(in_features)
    weight = jax.random.uniform(
        kw, (out_features, in_features), dtype, minval=-bound, maxval=bound
    )
    bias = jax.random.uniform(
        kb, (out_features,), dtype, minval=-bound, maxval=bound
    )
    return weight, bias


if __name__ == "__main__":
    # Small shapes consistent with the module: in_shape=(8,16), out_shape=(16,32).
    in_shape = (8, 16)      # in_features = 128
    out_shape = (16, 32)    # out_features = 512
    batch = 2

    key = jax.random.PRNGKey(0)
    kx, kp = jax.random.split(key)

    x = jax.random.normal(kx, (batch,) + in_shape, dtype=jnp.float32)
    weight, bias = init_linear_params(
        kp, math.prod(in_shape), math.prod(out_shape)
    )

    out = linear_model_forward(
        x, weight, bias, in_shape=in_shape, out_shape=out_shape
    )
    out = jax.block_until_ready(out)

    # Sanity check against plain-JAX reference (f32 compute -> tight tolerance).
    ref = (x.reshape(batch, -1) @ weight.T + bias).reshape(
        (batch,) + out_shape
    )
    assert out.shape == (batch,) + out_shape
    assert jnp.allclose(out, ref, atol=1e-5, rtol=1e-5)

    # Note: on v6e/v7x, pass compute_dtype=jnp.bfloat16 for ~3-4x MXU throughput
    # (loosen tolerances accordingly); f32 accumulation is kept inside the kernel.

    print("KERNEL_OK")
</pallas_src>

<mosaic_0001>
module attributes {stable_mosaic.version = 11 : i64} {
  func.func @_linear_kernel(%arg0: i32, %arg1: i32, %arg2: i32, %arg3: memref<8x128xf32, #tpu.memory_space<vmem>>, %arg4: memref<256x128xf32, #tpu.memory_space<vmem>>, %arg5: memref<1x256xf32, #tpu.memory_space<vmem>>, %arg6: memref<8x256xf32, #tpu.memory_space<vmem>>, %arg7: memref<8x256xf32, #tpu.memory_space<vmem>>) attributes {dimension_semantics = [#tpu.dimension_semantics<parallel>, #tpu.dimension_semantics<parallel>, #tpu.dimension_semantics<arbitrary>], iteration_bounds = array<i64: 1, 2, 1>, scalar_prefetch = 0 : i64, scratch_operands = 1 : i64, tpu.core_type = #tpu.core_type<tc>, window_params = [{transform_indices = @transform_0, window_bounds = array<i64: 8, 128>}, {transform_indices = @transform_1, window_bounds = array<i64: 256, 128>}, {transform_indices = @transform_2, window_bounds = array<i64: 1, 256>}, {transform_indices = @transform_3, window_bounds = array<i64: 8, 256>}]} {
    %c0_i32 = arith.constant 0 : i32
    %0 = arith.cmpi eq, %arg2, %c0_i32 : i32
    %1 = arith.extui %0 : i1 to i32
    %c0_i32_0 = arith.constant 0 : i32
    %2 = arith.cmpi ne, %1, %c0_i32_0 : i32
    scf.if %2 {
      %cst_10 = arith.constant 0.000000e+00 : f32
      %12 = vector.broadcast %cst_10 : f32 to vector<8x256xf32>
      %c0_11 = arith.constant 0 : index
      %c0_12 = arith.constant 0 : index
      %13 = vector.load %arg7[%c0_11, %c0_12] : memref<8x256xf32, #tpu.memory_space<vmem>>, vector<8x256xf32>
      tpu.vector_store %arg7[%c0_11, %c0_12], %12 {strides = array<i32>} : memref<8x256xf32, #tpu.memory_space<vmem>>, vector<8x256xf32>,
    } else {
    }
    %c0 = arith.constant 0 : index
    %c0_1 = arith.constant 0 : index
    %3 = vector.load %arg7[%c0, %c0_1] : memref<8x256xf32, #tpu.memory_space<vmem>>, vector<8x256xf32>
    %c0_2 = arith.constant 0 : index
    %c0_3 = arith.constant 0 : index
    %4 = vector.load %arg3[%c0_2, %c0_3] : memref<8x128xf32, #tpu.memory_space<vmem>>, vector<8x128xf32>
    %c0_4 = arith.constant 0 : index
    %c0_5 = arith.constant 0 : index
    %5 = vector.load %arg4[%c0_4, %c0_5] : memref<256x128xf32, #tpu.memory_space<vmem>>, vector<256x128xf32>
    %cst = arith.constant dense<0.000000e+00> : vector<8x256xf32>
    %6 = tpu.matmul %4, %5, %cst {dimension_numbers = #tpu.dot_dimension_numbers<[1], [1], [0], [0], [0, 0, 1, 0], [], []>} : vector<8x128xf32>, vector<256x128xf32>, vector<8x256xf32> -> vector<8x256xf32>
    %7 = arith.addf %3, %6 : vector<8x256xf32>
    %c0_6 = arith.constant 0 : index
    %c0_7 = arith.constant 0 : index
    %8 = vector.load %arg7[%c0_6, %c0_7] : memref<8x256xf32, #tpu.memory_space<vmem>>, vector<8x256xf32>
    tpu.vector_store %arg7[%c0_6, %c0_7], %7 {strides = array<i32>} : memref<8x256xf32, #tpu.memory_space<vmem>>, vector<8x256xf32>,
    %c0_i32_8 = arith.constant 0 : i32
    %9 = arith.cmpi eq, %arg2, %c0_i32_8 : i32
    %10 = arith.extui %9 : i1 to i32
    %c0_i32_9 = arith.constant 0 : i32
    %11 = arith.cmpi ne, %10, %c0_i32_9 : i32
    scf.if %11 {
      %c0_10 = arith.constant 0 : index
      %c0_11 = arith.constant 0 : index
      %12 = vector.load %arg7[%c0_10, %c0_11] : memref<8x256xf32, #tpu.memory_space<vmem>>, vector<8x256xf32>
      %c0_12 = arith.constant 0 : index
      %c0_13 = arith.constant 0 : index
      %13 = vector.load %arg5[%c0_12, %c0_13] : memref<1x256xf32, #tpu.memory_space<vmem>>, vector<1x256xf32>
      %14 = vector.broadcast %13 : vector<1x256xf32> to vector<8x256xf32>
      %15 = arith.addf %12, %14 : vector<8x256xf32>
      %c0_14 = arith.constant 0 : index
      %c0_15 = arith.constant 0 : index
      %16 = vector.load %arg6[%c0_14, %c0_15] : memref<8x256xf32, #tpu.memory_space<vmem>>, vector<8x256xf32>
      tpu.vector_store %arg6[%c0_14, %c0_15], %15 {strides = array<i32>} : memref<8x256xf32, #tpu.memory_space<vmem>>, vector<8x256xf32>,
    } else {
    }
    return
  }
  func.func @transform_0(%arg0: i32, %arg1: i32, %arg2: i32) -> (i32, i32) {
    %c0_i32 = arith.constant 0 : i32
    return %arg0, %arg2 : i32, i32
  }
  func.func @transform_1(%arg0: i32, %arg1: i32, %arg2: i32) -> (i32, i32) {
    %c0_i32 = arith.constant 0 : i32
    return %arg1, %arg2 : i32, i32
  }
  func.func @transform_2(%arg0: i32, %arg1: i32, %arg2: i32) -> (i32, i32) {
    %c0_i32 = arith.constant 0 : i32
    %c0_i32_0 = arith.constant 0 : i32
    return %c0_i32, %arg1 : i32, i32
  }
  func.func @transform_3(%arg0: i32, %arg1: i32, %arg2: i32) -> (i32, i32) {
    %c0_i32 = arith.constant 0 : i32
    return %arg0, %arg1 : i32, i32
  }
}

</mosaic_0001>

<bundles_post_ra>
// kernel: linear_model_forward.1
= control target key start
LH: loop header
LB: loop body
LE: loop exit
PB: predicated region body
PF: predicated region fallthrough
CT: control target
= control target key end

     0   :  { %8 = vsyncpa [#allocation4], 0  ;;  %s940_s0 = inlined_call_operand.vmem [shape: f32[8,128], index: 0, kind: input, shape index: {}]   ;;  %s941_s1 = inlined_call_operand.hbm [shape: f32[512,128], index: 1, kind: input, shape index: {}]   ;;  %s942_s2 = inlined_call_operand.vmem [shape: f32[1,512], index: 2, kind: input, shape index: {}]   ;;  %s943_s3 = inlined_call_operand.vmem [shape: f32[8,512], index: 3, kind: output, shape index: {}]  }
   0x1   :  { %10 = vsyncpa [#allocation4 + $0x1], 0  ;;  %s777_s12 = smov 0   ;;  %s779_s13 = smov 0  }
   0x2   :  { %s781_s14 = smov 0   ;;  %s783_s15 = smov 0  }
   0x3   :  { %s785_s16 = smov 0   ;;  %s787_s17 = smov 0  }
   0x4 LB: > { %s533_s18 = sadd.s32 4294967295, %s752_s17   ;;  %s31_s19 = sadd.s32 1, %s748_s16  ;;  %s752_s17 = sphi %s787_s17, %s16_s17   ;;  %s748_s16 = sphi %s785_s16, %s951_s16   ;;  %s744_s15 = sphi %s783_s15, %s950_s15   ;;  %s740_s14 = sphi %s781_s14, %s949_s14   ;;  %s736_s13 = sphi %s779_s13, %s948_s13   ;;  %s732_s12 = sphi %s777_s12, %s947_s12  }
   0x5   : > { %p33_p0 = scmp.ge.s32.totalorder %s31_s19, 2  ;;  %s72_s20 = sadd.s32 1, %s740_s14 }
   0x6   : > { %p79_p1 = scmp.ne.s32.totalorder %s740_s14, %s736_s13  ;;  %p80_p2 = scmp.eq.s32.totalorder %s752_s17, 0 }
   0x7   : > { %s953_s19 = smov (%p33_p0, %s31_s19), 0  ;;  %p85_p4 = scmp.ne.s32.totalorder %s736_s13, %s732_s12 }
   0x8   : > { %p813_p3 = por %p80_p2, %p79_p1  ;;  %s67_s22 = ssub.s32 %s748_s16, %s953_s19 }
   0x9   : > { %p86_p5 = scmp.eq.s32.totalorder %s533_s18, 0  ;;  %p70_p6 = scmp.eq.s32.totalorder %s67_s22, 0 }
   0xa   : > { %p621_p8 = scmp.lt.s32.totalorder %s752_s17, 2  ;;  %s173_s25 = sand.u32 1, %s740_s14  }
   0xb   : > { %p820_p7 = por %p86_p5, %p85_p4  ;;  %s548_s26 = sshll.u32 %s748_s16, 12 }
   0xc   : > { %s826_s24 = scalar_select %p70_p6, %s740_s14, %s72_s20  }
   0xd   : > { %s538_s27 = sshll.u32 %s173_s25, 8  ;;  %s833_s30 = scalar_lea.hbm %s941_s1, %s548_s26 }
   0xe   : > { %s177_s4 = scalar_lea.vmem [#allocation3], %s538_s27  ;;  %p837_p9 = pnand %p621_p8, %p813_p3 }
   0xf   : > { %s185_s5 = sshll.u32 %s177_s4, 4  ;;  %s843_s7 = scalar_lea.sflag [#allocation4], %s173_s25  ;;  %s841_s5 = int_to_ptr.vmem [resolvable:$true] %s185_s5 }
  0x10   : > { %s672_s8 = scalar_lea.hbm %s833_s30, 4096  ;;  %p674_p11 = pneg %p837_p9 }
  0x11   : > { %p673_p10 = scmp.ne.s32.totalorder %s833_s30, %s672_s8  ;;  %s677_s11 = scalar_lea.hbm %s941_s1, 8192 }
  0x12   : > { %p678_p0 = scmp.lt.u32.totalorder %s833_s30, %s941_s1  ;;  %p679_p1 = scmp.lt.u32.totalorder %s677_s11, %s672_s8 }
  0x13   : > { %p675_p12 = pnand %p674_p11, %p673_p10  ;;  %p681_p3 = scmp.lt.u32.totalorder %s672_s8, %s833_s30 }
  0x14   : > { %p680_p2 = por %p679_p1, %p678_p0 }
  0x15   : > { %p676_p13 = pneg %p675_p12 }
  0x16   : > { %p682_p4 = por %p681_p3, %p680_p2 }
  0x18   : > { %p683_p5 = pnand %p682_p4, %p676_p13 }
  0x1a   : > { %686 = shalt.err (!%p683_p5)
}
  0x1b   : > { %s687_s20 = scalar_lea.vmem %s841_s5, 4096  ;;  %s754_s21 = smov [#allocation3]  }
  0x1c   : > { %p688_p6 = scmp.ne.s32.totalorder %s841_s5, %s687_s20  ;;  %s692_s22 = sshll.u32 %s754_s21, 4  ;;  %s693_s22 = int_to_ptr.vmem [resolvable:$false] %s692_s22 }
  0x1d   : > { %s694_s25 = scalar_lea.vmem %s693_s22, 8192  ;;  %p695_p12 = scmp.lt.s32.totalorder %s841_s5, %s693_s22 }
  0x1e   : > { %p690_p8 = pnand %p688_p6, %p674_p11  ;;  %p696_p0 = scmp.lt.s32.totalorder %s694_s25, %s687_s20 }
  0x20   : > { %p691_p10 = pneg %p690_p8  ;;  %p697_p1 = por %p696_p0, %p695_p12 }
  0x22   : > { %p698_p2 = pnand %p697_p1, %p691_p10 }
  0x24   : > { %701 = shalt.err (!%p698_p2)
}
  0x25   : > { %s755_s26 = smov 128   ;;  %s756_s27 = smov 8  }
  0x26   : > { %620 = dma.hbm_to_vmem [thread:$0]  (!%p837_p9), %s833_s30, 4096, %s841_s5, %s843_s7, %s755_s26, %s755_s26, %s756_s27  }
  0x27   : > { %p541_p11 = scmp.ge.s32.totalorder %s752_s17, 1  ;;  %p201_p13 = scmp.lt.s32.totalorder %s752_s17, 3 }
  0x29   : > { %p202_p3 = pnand %p541_p11, %p201_p13 }
  0x2a   : > { %s207_s28 = sand.u32 (!%p202_p3), 1, %s736_s13  }
  0x2b   : > { %205 = sbr.rel (%p202_p3) target bundleno = 334 (0x14e), region = 32  ;;  %s542_s29 = sshll.u32 (!%p202_p3), %s207_s28, 8 }
  0x2c   : > { %s208_s4 = scalar_lea.sflag (!%p202_p3), [#allocation4], %s207_s28  ;;  %s874_s8 = scalar_lea.vmem (!%p202_p3), [#allocation3], %s542_s29 }
  0x32   : > { %727 = dma.done.wait (%p820_p7), %s208_s4, 4096  }
  0x33   : > { %729 = vsyncadd (%p820_p7), %s208_s4, 4294963200  ;;  %v297_v0 = vld [vmem:[%s874_s8 + $0x80] sm:$0xff]  ;;  %v298_v1 = vld [vmem:[%s874_s8 + $0x88] sm:$0xff]  ;;  %s543_s5 = sshll.u32 %s744_s15, 1  ;;  %v395_v49 = vlaneseq }
  0x34   : > { %v281_v2 = vld [vmem:[%s874_s8] sm:$0xff]  ;;  %v583_v3 = vpack.c.bf16 %v298_v1, %v297_v0  ;;  %v282_v4 = vld [vmem:[%s874_s8 + $0x8] sm:$0xff]  ;;  %v299_v5 = vld [vmem:[%s874_s8 + $0x90] sm:$0xff]  ;;  %p258_p7 = scmp.lt.s32.totalorder %s543_s5, 3 }
  0x35   : > { %v300_v6 = vld [vmem:[%s874_s8 + $0x98] sm:$0xff]  ;;  %v585_v7 = vpack.c.bf16 %v282_v4, %v281_v2  ;;  %v283_v9 = vld [vmem:[%s874_s8 + $0x10] sm:$0xff]  ;;  %v301_v11 = vld [vmem:[%s874_s8 + $0xa0] sm:$0xff]  ;;  %v396_v50 = vshrl.u32 %v395_v49, 7 }
  0x36   : > { %v587_v8 = vpack.c.bf16 %v300_v6, %v299_v5  ;;  %584 = vmatprep.subr.bf16.mxu0 %v583_v3  ;;  %v284_v10 = vld [vmem:[%s874_s8 + $0x18] sm:$0xff]  ;;  %v302_v12 = vld [vmem:[%s874_s8 + $0xa8] sm:$0xff]  ;;  %v280_v15 = vld [vmem:[%s940_s0] sm:$0xff]  ;;  %s955_s5 = smov (!%p258_p7, %s543_s5), 3 }
  0x37   : > { %586 = vmatpush3.bf16.xpose.msra.mxu0 %v585_v7  ;;  %v589_v13 = vpack.c.bf16 %v284_v10, %v283_v9  ;;  %v591_v14 = vpack.c.bf16 %v302_v12, %v301_v11  ;;  %581 = vmatprep.mubr.f32.mxu0 %v280_v15  ;;  %v285_v16 = vld [vmem:[%s874_s8 + $0x20] sm:$0xff]  ;;  %v286_v17 = vld [vmem:[%s874_s8 + $0x28] sm:$0xff]  ;;  %v303_v18 = vld [vmem:[%s874_s8 + $0xb0] sm:$0xff]  ;;  %s260_s9 = scalar_lea.vmem %s942_s2, %s955_s5  ;;  %v397_v51 = vsub.s32 0, %v396_v50  ;;  %v401_v53 = vsub.s32 1, %v396_v50  ;;  %s545_s10 = sshll.u32 %s955_s5, 3 }
  0x38   : > { %588 = vmatprep.subr.bf16.mxu0 %v587_v8  ;;  %v304_v19 = vld [vmem:[%s874_s8 + $0xb8] sm:$0xff]  ;;  %v593_v20 = vpack.c.bf16 %v286_v17, %v285_v16  ;;  %v287_v22 = vld [vmem:[%s874_s8 + $0x30] sm:$0xff]  ;;  %v305_v24 = vld [vmem:[%s874_s8 + $0xc0] sm:$0xff]  ;;  %s270_s18 = scalar_lea.vmem %s943_s3, %s545_s10 }
  0x39   : > { %v595_v21 = vpack.c.bf16 %v304_v19, %v303_v18  ;;  %v288_v23 = vld [vmem:[%s874_s8 + $0x38] sm:$0xff]  ;;  %v306_v25 = vld [vmem:[%s874_s8 + $0xc8] sm:$0xff]  ;;  %v289_v28 = vld [vmem:[%s874_s8 + $0x40] sm:$0xff] }
  0x3a   : > { %v597_v26 = vpack.c.bf16 %v288_v23, %v287_v22  ;;  %v599_v27 = vpack.c.bf16 %v306_v25, %v305_v24  ;;  %v290_v29 = vld [vmem:[%s874_s8 + $0x48] sm:$0xff]  ;;  %v307_v30 = vld [vmem:[%s874_s8 + $0xd0] sm:$0xff]  ;;  %v308_v31 = vld [vmem:[%s874_s8 + $0xd8] sm:$0xff] }
  0x3b   : > { %v601_v32 = vpack.c.bf16 %v290_v29, %v289_v28  ;;  %v603_v33 = vpack.c.bf16 %v308_v31, %v307_v30  ;;  %v291_v34 = vld [vmem:[%s874_s8 + $0x50] sm:$0xff]  ;;  %v292_v35 = vld [vmem:[%s874_s8 + $0x58] sm:$0xff]  ;;  %v309_v36 = vld [vmem:[%s874_s8 + $0xe0] sm:$0xff] }
  0x3c   : > { %v310_v37 = vld [vmem:[%s874_s8 + $0xe8] sm:$0xff]  ;;  %v605_v38 = vpack.c.bf16 %v292_v35, %v291_v34  ;;  %v293_v40 = vld [vmem:[%s874_s8 + $0x60] sm:$0xff]  ;;  %v311_v42 = vld [vmem:[%s874_s8 + $0xf0] sm:$0xff] }
  0x3d   : > { %v607_v39 = vpack.c.bf16 %v310_v37, %v309_v36  ;;  %v294_v41 = vld [vmem:[%s874_s8 + $0x68] sm:$0xff]  ;;  %v312_v43 = vld [vmem:[%s874_s8 + $0xf8] sm:$0xff]  ;;  %v295_v46 = vld [vmem:[%s874_s8 + $0x70] sm:$0xff] }
  0x3e   : > { %v609_v44 = vpack.c.bf16 %v294_v41, %v293_v40  ;;  %v611_v45 = vpack.c.bf16 %v312_v43, %v311_v42  ;;  %v296_v47 = vld [vmem:[%s874_s8 + $0x78] sm:$0xff]  ;;  %v393_v52 = vld [vmem:[%s260_s9] sm:$0x3] }
  0x3f   : > { %590 = vmatpush3.bf16.xpose.msra.mxu0 %v589_v13  ;;  %v613_v48 = vpack.c.bf16 %v296_v47, %v295_v46  ;;  %v398_v54 = vrot.slane %v393_v52, %v397_v51  ;;  %v402_v55 = vrot.slane %v393_v52, %v401_v53 }
  0x40   : > { %592 = vmatprep.subr.bf16.mxu0 %v591_v14 }
  0x47   : > { %594 = vmatpush3.bf16.xpose.msra.mxu0 %v593_v20 }
  0x48   : > { %596 = vmatprep.subr.bf16.mxu0 %v595_v21 }
  0x4f   : > { %598 = vmatpush3.bf16.xpose.msra.mxu0 %v597_v26 }
  0x50   : > { %600 = vmatprep.subr.bf16.mxu0 %v599_v27 }
  0x57   : > { %602 = vmatpush3.bf16.xpose.msra.mxu0 %v601_v32 }
  0x58   : > { %604 = vmatprep.subr.bf16.mxu0 %v603_v33 }
  0x5f   : > { %606 = vmatpush3.bf16.xpose.msra.mxu0 %v605_v38 }
  0x60   : > { %608 = vmatprep.subr.bf16.mxu0 %v607_v39 }
  0x67   : > { %610 = vmatpush3.bf16.xpose.msra.mxu0 %v609_v44 }
  0x68   : > { %612 = vmatprep.subr.bf16.mxu0 %v611_v45 }
  0x6f   : > { %614 = vmatpush3.bf16.xpose.msra.mxu0 %v613_v48 }
  0x76   : > { %582 = vmatmul.mubr.f32.vlgmr.msra.gmra.mrb[0].mxu0 %v280_v15 }
 0x149   : > { %v379_v56 = vpop.f32.mrb[0].mxu0 }
 0x14a   : > { %v405_v57 = vadd.f32 %v398_v54, %v379_v56  ;;  %v381_v58 = vpop.f32.mrb[1].mxu0 }
 0x14b   : > { %v406_v59 = vadd.f32 %v402_v55, %v381_v58 }
 0x14c   : > { %407 = vst [vmem:[%s270_s18] sm:$0xff] %v405_v57 }
 0x14d   : > { %408 = vst [vmem:[%s270_s18 + $0x8] sm:$0xff] %v406_v59 }
 0x14e PF: > { %s16_s17 = sadd.s32 1, %s752_s17   ;;  %s947_s12 = smov %s736_s13 }
 0x14f   : > { %p13_p9 = scmp.ge.s32.totalorder %s16_s17, 4   ;;  %s948_s13 = smov %s740_s14 }
 0x150   : > { %s949_s14 = smov %s826_s24  ;;  %s950_s15 = smov %s748_s16 }
 0x151   : > { %s951_s16 = smov %s953_s19  ;;  %15 = sbr.rel (!%p13_p9) target bundleno = 4 (0x4), region = 86 }
 0x158   :  { %439 = vsyncpa [#allocation4], 1 }
 0x159   :  { %441 = vsyncpa [#allocation4 + $0x1], 1 }

</bundles_post_ra>
